<compile_context>
chip_gen: v5e
topology: v5e:2x2
jax: 0.10.0
libtpu: 0.0.40
codegen_flags: <defaults>
</compile_context>

<pallas_src>
import functools

import jax
import jax.numpy as jnp
from jax.experimental import pallas as pl
from jax.experimental.pallas import tpu as pltpu


# ----------------------------- config (mirrors `c = config()`) ---------------
D_MODEL = 32          # c.d_model
HIDDEN = 4 * D_MODEL  # 4 * c.d_model
DROPOUT = 0.1         # c.dropout


def _round_up(n, m):
    return ((n + m - 1) // m) * m


def _ffn_compute(x_ref, w1_ref, b1_ref, w2_ref, b2_ref):
    """relu(x @ W1 + b1) @ W2 + b2 — bf16 MXU inputs, f32 accumulation/VPU."""
    x = x_ref[...].astype(jnp.bfloat16)
    h = jnp.dot(x, w1_ref[...], preferred_element_type=jnp.float32)
    h = jnp.maximum(h + b1_ref[...], 0.0)                    # bias + ReLU in f32
    y = jnp.dot(h.astype(jnp.bfloat16), w2_ref[...],
                preferred_element_type=jnp.float32)
    return y + b2_ref[...]


def _ffn_kernel_eval(x_ref, w1_ref, b1_ref, w2_ref, b2_ref, o_ref):
    o_ref[...] = _ffn_compute(x_ref, w1_ref, b1_ref, w2_ref, b2_ref).astype(o_ref.dtype)


def _ffn_kernel_train(seed_ref, x_ref, w1_ref, b1_ref, w2_ref, b2_ref, o_ref,
                      *, dropout):
    y = _ffn_compute(x_ref, w1_ref, b1_ref, w2_ref, b2_ref)
    # Inverted dropout with the TPU hardware PRNG.  Integer-threshold compare
    # on the raw bits (no u32->f32 convert/multiply); the 1/(1-p) scale is
    # folded into a single select operand.  Seeded per row-tile, so the mask
    # depends on the tiling choice (documented, not a correctness issue).
    pltpu.prng_seed(seed_ref[0] + pl.program_id(0))
    bits = pltpu.bitcast(pltpu.prng_random_bits(y.shape), jnp.uint32)
    thresh = jnp.uint32(min(int(round(dropout * 4294967296.0)), 4294967295))
    keep = bits >= thresh
    scale = jnp.float32(1.0 / (1.0 - dropout))
    o_ref[...] = jnp.where(keep, y * scale, 0.0).astype(o_ref.dtype)


def feed_forward(x, w1, b1, w2, b2, *, dropout=DROPOUT, training=False,
                 seed=0, target_rows_per_tile=1024):
    """x: (..., d_model) -> (..., d_model). Fused FFN Pallas kernel."""
    orig_shape = x.shape
    d_model = orig_shape[-1]
    hidden = w1.shape[1]
    b1 = jnp.asarray(b1).reshape(1, hidden)
    b2 = jnp.asarray(b2).reshape(1, d_model)

    x2d = x.reshape(-1, d_model)
    rows = x2d.shape[0]

    # Lane-dense packing: fold `pack` consecutive logical rows into one
    # 128-lane row (d_model=32 -> pack=4) so all kernel loads/stores are
    # unmasked full-lane accesses.
    pack = 128 // d_model if (d_model < 128 and 128 % d_model == 0) else 1
    lane = pack * d_model

    # Row tiling: cap rows per grid step so the grid has several steps and the
    # auto-pipeline can overlap DMA with compute; handle ragged row counts by
    # zero-padding to a tile multiple (sliced off below).
    packed_rows = pl.cdiv(rows, pack)
    tgt = max(8, target_rows_per_tile // pack)
    tile_p = _round_up(min(tgt, packed_rows), 8)              # packed rows/tile
    padded_packed_rows = _round_up(packed_rows, tile_p)
    padded_rows = padded_packed_rows * pack
    num_tiles = padded_packed_rows // tile_p

    if padded_rows != rows:
        x2d = jnp.pad(x2d, ((0, padded_rows - rows), (0, 0)))
    x_packed = x2d.reshape(padded_packed_rows, lane)          # free row-major reshape

    # Block-diagonal weight expansion: x_packed @ kron(I_pack, W1) computes the
    # same per-row Linear on the packed layout, and lifts the MXU contraction
    # dim from 32 to 128.  Weights cast to bf16 (halves weight DMA); biases f32.
    eye = jnp.eye(pack, dtype=w1.dtype)
    w1_big = jnp.kron(eye, w1).astype(jnp.bfloat16)           # (lane, pack*hidden)
    w2_big = jnp.kron(eye, w2).astype(jnp.bfloat16)           # (pack*hidden, lane)
    b1_big = jnp.tile(b1.astype(jnp.float32), (1, pack))      # (1, pack*hidden)
    b2_big = jnp.tile(b2.astype(jnp.float32), (1, pack))      # (1, lane)

    out_shape = jax.ShapeDtypeStruct((padded_packed_rows, lane), x.dtype)
    compiler_params = pltpu.CompilerParams(
        dimension_semantics=("parallel",))   # independent row tiles -> both TCs on v7x

    if training and dropout > 0.0:
        seed_arr = jnp.array([seed], dtype=jnp.int32)
        out_packed = pl.pallas_call(
            functools.partial(_ffn_kernel_train, dropout=dropout),
            out_shape=out_shape,
            grid_spec=pltpu.PrefetchScalarGridSpec(
                num_scalar_prefetch=1,
                grid=(num_tiles,),
                in_specs=[
                    pl.BlockSpec((tile_p, lane), lambda i, s: (i, 0)),
                    pl.BlockSpec((lane, pack * hidden), lambda i, s: (0, 0)),
                    pl.BlockSpec((1, pack * hidden), lambda i, s: (0, 0)),
                    pl.BlockSpec((pack * hidden, lane), lambda i, s: (0, 0)),
                    pl.BlockSpec((1, lane), lambda i, s: (0, 0)),
                ],
                out_specs=pl.BlockSpec((tile_p, lane), lambda i, s: (i, 0)),
            ),
            compiler_params=compiler_params,
        )(seed_arr, x_packed, w1_big, b1_big, w2_big, b2_big)
    else:
        # Eval / inference path: no scalar-prefetch seed, no dropout work.
        out_packed = pl.pallas_call(
            _ffn_kernel_eval,
            out_shape=out_shape,
            grid=(num_tiles,),
            in_specs=[
                pl.BlockSpec((tile_p, lane), lambda i: (i, 0)),
                pl.BlockSpec((lane, pack * hidden), lambda i: (0, 0)),
                pl.BlockSpec((1, pack * hidden), lambda i: (0, 0)),
                pl.BlockSpec((pack * hidden, lane), lambda i: (0, 0)),
                pl.BlockSpec((1, lane), lambda i: (0, 0)),
            ],
            out_specs=pl.BlockSpec((tile_p, lane), lambda i: (i, 0)),
            compiler_params=compiler_params,
        )(x_packed, w1_big, b1_big, w2_big, b2_big)

    out2d = out_packed.reshape(padded_rows, d_model)
    if padded_rows != rows:
        out2d = out2d[:rows]
    return out2d.reshape(orig_shape)


def init_params(key, d_model=D_MODEL, hidden=HIDDEN, dtype=jnp.float32):
    """Deterministic init matching nn.Linear shapes (weights stored transposed)."""
    k1, k2, k3, k4 = jax.random.split(key, 4)
    lim1 = 1.0 / (d_model ** 0.5)
    lim2 = 1.0 / (hidden ** 0.5)
    w1 = jax.random.uniform(k1, (d_model, hidden), dtype, -lim1, lim1)
    b1 = jax.random.uniform(k2, (1, hidden), dtype, -lim1, lim1)
    w2 = jax.random.uniform(k3, (hidden, d_model), dtype, -lim2, lim2)
    b2 = jax.random.uniform(k4, (1, d_model), dtype, -lim2, lim2)
    return w1, b1, w2, b2


if __name__ == "__main__":
    key = jax.random.PRNGKey(0)
    kx, kp = jax.random.split(key)

    batch, seq = 2, 8
    x = jax.random.normal(kx, (batch, seq, D_MODEL), dtype=jnp.float32)
    w1, b1, w2, b2 = init_params(kp)

    # eval-mode forward (dropout = identity), matches torch .eval() semantics
    out = feed_forward(x, w1, b1, w2, b2, training=False)
    out = jax.block_until_ready(out)

    # reference in plain JAX with the same bf16 MXU inputs / f32 accumulation
    xb = x.reshape(-1, D_MODEL).astype(jnp.bfloat16)
    h_ref = jnp.dot(xb, w1.astype(jnp.bfloat16),
                    preferred_element_type=jnp.float32) + b1
    h_ref = jnp.maximum(h_ref, 0.0)
    ref = jnp.dot(h_ref.astype(jnp.bfloat16), w2.astype(jnp.bfloat16),
                  preferred_element_type=jnp.float32) + b2
    ref = ref.reshape(x.shape).astype(x.dtype)

    assert out.shape == x.shape
    assert jnp.allclose(out, ref, atol=1e-2, rtol=1e-2), float(
        jnp.max(jnp.abs(out - ref)))

    print("KERNEL_OK")
</pallas_src>

<mosaic_0001>
module attributes {stable_mosaic.version = 11 : i64} {
  func.func @_ffn_kernel_eval(%arg0: i32, %arg1: memref<8x128xf32, #tpu.memory_space<vmem>>, %arg2: memref<128x512xbf16, #tpu.memory_space<vmem>>, %arg3: memref<1x512xf32, #tpu.memory_space<vmem>>, %arg4: memref<512x128xbf16, #tpu.memory_space<vmem>>, %arg5: memref<1x128xf32, #tpu.memory_space<vmem>>, %arg6: memref<8x128xf32, #tpu.memory_space<vmem>>) attributes {dimension_semantics = [#tpu.dimension_semantics<parallel>], iteration_bounds = array<i64: 1>, scalar_prefetch = 0 : i64, scratch_operands = 0 : i64, tpu.core_type = #tpu.core_type<tc>, window_params = [{transform_indices = @transform_0, window_bounds = array<i64: 8, 128>}, {pipeline_mode = #tpu.pipeline_mode<synchronous>, transform_indices = @transform_1, window_bounds = array<i64: 128, 512>}, {pipeline_mode = #tpu.pipeline_mode<synchronous>, transform_indices = @transform_2, window_bounds = array<i64: 1, 512>}, {pipeline_mode = #tpu.pipeline_mode<synchronous>, transform_indices = @transform_3, window_bounds = array<i64: 512, 128>}, {pipeline_mode = #tpu.pipeline_mode<synchronous>, transform_indices = @transform_4, window_bounds = array<i64: 1, 128>}, {transform_indices = @transform_5, window_bounds = array<i64: 8, 128>}]} {
    %c0 = arith.constant 0 : index
    %c0_0 = arith.constant 0 : index
    %0 = vector.load %arg1[%c0, %c0_0] : memref<8x128xf32, #tpu.memory_space<vmem>>, vector<8x128xf32>
    %1 = arith.truncf %0 : vector<8x128xf32> to vector<8x128xbf16>
    %c0_1 = arith.constant 0 : index
    %c0_2 = arith.constant 0 : index
    %2 = vector.load %arg2[%c0_1, %c0_2] : memref<128x512xbf16, #tpu.memory_space<vmem>>, vector<128x512xbf16>
    %cst = arith.constant dense<0.000000e+00> : vector<8x512xf32>
    %3 = tpu.matmul %1, %2, %cst {dimension_numbers = #tpu.dot_dimension_numbers<[1], [0], [0], [1], [0, 0, 1, 1], [], []>} : vector<8x128xbf16>, vector<128x512xbf16>, vector<8x512xf32> -> vector<8x512xf32>
    %c0_3 = arith.constant 0 : index
    %c0_4 = arith.constant 0 : index
    %4 = vector.load %arg3[%c0_3, %c0_4] : memref<1x512xf32, #tpu.memory_space<vmem>>, vector<1x512xf32>
    %5 = vector.broadcast %4 : vector<1x512xf32> to vector<8x512xf32>
    %6 = arith.addf %3, %5 : vector<8x512xf32>
    %cst_5 = arith.constant 0.000000e+00 : f32
    %7 = vector.broadcast %cst_5 : f32 to vector<8x512xf32>
    %8 = arith.maximumf %6, %7 : vector<8x512xf32>
    %9 = arith.truncf %8 : vector<8x512xf32> to vector<8x512xbf16>
    %c0_6 = arith.constant 0 : index
    %c0_7 = arith.constant 0 : index
    %10 = vector.load %arg4[%c0_6, %c0_7] : memref<512x128xbf16, #tpu.memory_space<vmem>>, vector<512x128xbf16>
    %cst_8 = arith.constant dense<0.000000e+00> : vector<8x128xf32>
    %11 = tpu.matmul %9, %10, %cst_8 {dimension_numbers = #tpu.dot_dimension_numbers<[1], [0], [0], [1], [0, 0, 1, 1], [], []>} : vector<8x512xbf16>, vector<512x128xbf16>, vector<8x128xf32> -> vector<8x128xf32>
    %c0_9 = arith.constant 0 : index
    %c0_10 = arith.constant 0 : index
    %12 = vector.load %arg5[%c0_9, %c0_10] : memref<1x128xf32, #tpu.memory_space<vmem>>, vector<1x128xf32>
    %13 = vector.broadcast %12 : vector<1x128xf32> to vector<8x128xf32>
    %14 = arith.addf %11, %13 : vector<8x128xf32>
    %c0_11 = arith.constant 0 : index
    %c0_12 = arith.constant 0 : index
    %15 = vector.load %arg6[%c0_11, %c0_12] : memref<8x128xf32, #tpu.memory_space<vmem>>, vector<8x128xf32>
    tpu.vector_store %arg6[%c0_11, %c0_12], %14 {strides = array<i32>} : memref<8x128xf32, #tpu.memory_space<vmem>>, vector<8x128xf32>,
    return
  }
  func.func @transform_0(%arg0: i32) -> (i32, i32) {
    %c0_i32 = arith.constant 0 : i32
    %c0_i32_0 = arith.constant 0 : i32
    return %arg0, %c0_i32 : i32, i32
  }
  func.func @transform_1(%arg0: i32) -> (i32, i32) {
    %c0_i32 = arith.constant 0 : i32
    %c0_i32_0 = arith.constant 0 : i32
    %c0_i32_1 = arith.constant 0 : i32
    return %c0_i32, %c0_i32_0 : i32, i32
  }
  func.func @transform_2(%arg0: i32) -> (i32, i32) {
    %c0_i32 = arith.constant 0 : i32
    %c0_i32_0 = arith.constant 0 : i32
    %c0_i32_1 = arith.constant 0 : i32
    return %c0_i32, %c0_i32_0 : i32, i32
  }
  func.func @transform_3(%arg0: i32) -> (i32, i32) {
    %c0_i32 = arith.constant 0 : i32
    %c0_i32_0 = arith.constant 0 : i32
    %c0_i32_1 = arith.constant 0 : i32
    return %c0_i32, %c0_i32_0 : i32, i32
  }
  func.func @transform_4(%arg0: i32) -> (i32, i32) {
    %c0_i32 = arith.constant 0 : i32
    %c0_i32_0 = arith.constant 0 : i32
    %c0_i32_1 = arith.constant 0 : i32
    return %c0_i32, %c0_i32_0 : i32, i32
  }
  func.func @transform_5(%arg0: i32) -> (i32, i32) {
    %c0_i32 = arith.constant 0 : i32
    %c0_i32_0 = arith.constant 0 : i32
    return %arg0, %c0_i32 : i32, i32
  }
}

</mosaic_0001>

<bundles_post_ra>
// kernel: tpu_custom_call.1
= control target key start
LH: loop header
LB: loop body
LE: loop exit
PB: predicated region body
PF: predicated region fallthrough
CT: control target
= control target key end

     0   :  { %10 = vsyncpa [#allocation3], 0  ;;  %s1191_s0 = inlined_call_operand.hbm [shape: f32[8,128], index: 0, kind: input, shape index: {}]   ;;  %s1192_s1 = inlined_call_operand.hbm [shape: bf16[128,512], index: 1, kind: input, shape index: {}]   ;;  %s1193_s2 = inlined_call_operand.hbm [shape: f32[1,512], index: 2, kind: input, shape index: {}]   ;;  %s1194_s3 = inlined_call_operand.hbm [shape: bf16[512,128], index: 3, kind: input, shape index: {}]   ;;  %s1195_s4 = inlined_call_operand.vmem [shape: f32[1,128], index: 4, kind: input, shape index: {}]   ;;  %s1196_s5 = inlined_call_operand.hbm [shape: f32[8,128], index: 5, kind: output, shape index: {}]  }
   0x1   :  { %11 = vsyncpa [#allocation6], 0 }
   0x2   :  { %12 = vsyncpa [#allocation9], 0  ;;  %s29_s20 = sshll.u32 %s1192_s1, 4  ;;  %s30_s20 = int_to_ptr.hbm [resolvable:$true] %s29_s20 }
   0x3   :  { %13 = vsyncpa [#allocation4], 0  ;;  %s1134_s21 = smov [#allocation5]   ;;  %s19_s25 = sshll.u32 %s1191_s0, 4  ;;  %s20_s25 = int_to_ptr.hbm [resolvable:$true] %s19_s25 }
   0x4   :  { %s31_s22 = sshll.u32 %s1134_s21, 4  ;;  %s1135_s26 = smov 256   ;;  %s32_s22 = int_to_ptr.vmem [resolvable:$true] %s31_s22 }
   0x5   :  { %s1136_s27 = smov 16   ;;  %s1137_s28 = smov [#allocation2]  }
   0x6   :  { %37 = dma.hbm_to_vmem [thread:$0]  %s30_s20, 4096, %s32_s22, [#allocation6], %s1135_s26, %s1135_s26, %s1136_s27  }
   0x7   :  { %s21_s29 = sshll.u32 %s1137_s28, 4  ;;  %s43_s7 = sshll.u32 %s1193_s2, 4  ;;  %s22_s29 = int_to_ptr.vmem [resolvable:$true] %s21_s29  ;;  %s44_s7 = int_to_ptr.hbm [resolvable:$true] %s43_s7 }
   0x8   :  { %24 = dma.hbm_to_vmem [thread:$0]  %s20_s25, 128, %s22_s29, [#allocation3]  }
   0x9   :  { %s53_s9 = sshll.u32 %s1194_s3, 4  ;;  %s1138_s10 = smov [#allocation7]   ;;  %s54_s9 = int_to_ptr.hbm [resolvable:$true] %s53_s9 }
   0xa   :  { %s45_s11 = sshll.u32 %s1138_s10, 4  ;;  %s1139_s0 = smov [#allocation8]   ;;  %s46_s11 = int_to_ptr.vmem [resolvable:$true] %s45_s11 }
   0xb   :  { %48 = dma.hbm_to_vmem [thread:$0]  %s44_s7, 64, %s46_s11, [#allocation6]  }
   0xc   :  { %s55_s12 = sshll.u32 %s1139_s0, 4  ;;  %s1140_s13 = smov 64   ;;  %s56_s12 = int_to_ptr.vmem [resolvable:$true] %s55_s12 }
   0xd   :  { %s1141_s14 = smov 4  }
   0xe   :  { %61 = dma.hbm_to_vmem [thread:$0]  %s54_s9, 4096, %s56_s12, [#allocation9], %s1140_s13, %s1140_s13, %s1141_s14  }
   0xf   :  { %1126 = dma.done.wait [#allocation3], 128  }
  0x10   :  { %1127 = vsyncadd [#allocation3], 4294967168 }
  0x11   :  { %1128 = dma.done.wait [#allocation6], 4160  }
  0x12   :  { %1129 = vsyncadd [#allocation6], 4294963136 }
  0x13   :  { %1130 = dma.done.wait [#allocation9], 4096  }
  0x14   :  { %1131 = vsyncadd [#allocation9], 4294963200  ;;  %v798_v0 = vld [vmem:[#allocation5 + $0xe8] sm:$0xf]  ;;  %v963_v1 = vld [vmem:[#allocation5 + $0xf4] sm:$0xf0] }
  0x15   :  { %v961_v2 = vld [vmem:[#allocation5 + $0xec] sm:$0xf]  ;;  %v799_v3 = vor.u32 %v963_v1, %v798_v0  ;;  %v800_v4 = vld [vmem:[#allocation5 + $0xf8] sm:$0xf0]  ;;  %v790_v5 = vld [vmem:[#allocation5 + $0xe0] sm:$0xf] }
  0x16   :  { %v962_v6 = vld [vmem:[#allocation5 + $0xec] sm:$0xf0]  ;;  %v803_v7 = vor.u32 %v961_v2, %v800_v4  ;;  %v960_v9 = vld [vmem:[#allocation5 + $0xe4] sm:$0xf]  ;;  %v792_v10 = vld [vmem:[#allocation5 + $0xf0] sm:$0xf0] }
  0x17   :  { %v791_v8 = vor.u32 %v962_v6, %v790_v5  ;;  %v782_v11 = vld [vmem:[#allocation5 + $0xc8] sm:$0xf]  ;;  %310 = vmatpush.bf16.msra.mxu2 %v799_v3  ;;  %v795_v12 = vor.u32 %v960_v9, %v792_v10  ;;  %v959_v13 = vld [vmem:[#allocation5 + $0xd4] sm:$0xf0]  ;;  %v957_v14 = vld [vmem:[#allocation5 + $0xcc] sm:$0xf] }
  0x18   :  { %v784_v15 = vld [vmem:[#allocation5 + $0xd8] sm:$0xf0]  ;;  %323 = vmatpush.bf16.msra.mxu3 %v803_v7  ;;  %v783_v16 = vor.u32 %v959_v13, %v782_v11  ;;  %v774_v18 = vld [vmem:[#allocation5 + $0xc0] sm:$0xf]  ;;  %v958_v19 = vld [vmem:[#allocation5 + $0xcc] sm:$0xf0] }
  0x19   :  { %284 = vmatpush.bf16.msra.mxu0 %v791_v8  ;;  %v787_v17 = vor.u32 %v957_v14, %v784_v15  ;;  %v956_v20 = vld [vmem:[#allocation5 + $0xc4] sm:$0xf]  ;;  %297 = vmatpush.bf16.msra.mxu1 %v795_v12  ;;  %v775_v21 = vor.u32 %v958_v19, %v774_v18  ;;  %v776_v22 = vld [vmem:[#allocation5 + $0xd0] sm:$0xf0]  ;;  %v766_v23 = vld [vmem:[#allocation5 + $0xa8] sm:$0xf] }
  0x1a   :  { %v955_v24 = vld [vmem:[#allocation5 + $0xb4] sm:$0xf0]  ;;  %v779_v25 = vor.u32 %v956_v20, %v776_v22  ;;  %v953_v26 = vld [vmem:[#allocation5 + $0xac] sm:$0xf]  ;;  %v768_v27 = vld [vmem:[#allocation5 + $0xb8] sm:$0xf0] }
  0x1b   :  { %v758_v28 = vld [vmem:[#allocation5 + $0xa0] sm:$0xf]  ;;  %311 = vmatpush.bf16.msra.mxu2 %v783_v16  ;;  %v767_v29 = vor.u32 %v955_v24, %v766_v23  ;;  %v954_v30 = vld [vmem:[#allocation5 + $0xac] sm:$0xf0]  ;;  %v952_v31 = vld [vmem:[#allocation5 + $0xa4] sm:$0xf]  ;;  %v771_v33 = vor.u32 %v953_v26, %v768_v27 }
  0x1c   :  { %v760_v32 = vld [vmem:[#allocation5 + $0xb0] sm:$0xf0]  ;;  %324 = vmatpush.bf16.msra.mxu3 %v787_v17  ;;  %v759_v34 = vor.u32 %v954_v30, %v758_v28  ;;  %v750_v35 = vld [vmem:[#allocation5 + $0x88] sm:$0xf]  ;;  %v951_v36 = vld [vmem:[#allocation5 + $0x94] sm:$0xf0] }
  0x1d   :  { %285 = vmatpush.bf16.msra.mxu0 %v775_v21  ;;  %v949_v37 = vld [vmem:[#allocation5 + $0x8c] sm:$0xf]  ;;  %298 = vmatpush.bf16.msra.mxu1 %v779_v25  ;;  %v763_v38 = vor.u32 %v952_v31, %v760_v32  ;;  %v752_v39 = vld [vmem:[#allocation5 + $0x98] sm:$0xf0]  ;;  %v742_v40 = vld [vmem:[#allocation5 + $0x80] sm:$0xf]  ;;  %v751_v44 = vor.u32 %v951_v36, %v750_v35 }
  0x1e   :  { %v950_v41 = vld [vmem:[#allocation5 + $0x8c] sm:$0xf0]  ;;  %v948_v42 = vld [vmem:[#allocation5 + $0x84] sm:$0xf]  ;;  %v744_v43 = vld [vmem:[#allocation5 + $0x90] sm:$0xf0]  ;;  %v755_v45 = vor.u32 %v949_v37, %v752_v39 }
  0x1f   :  { %312 = vmatpush.bf16.msra.mxu2 %v767_v29  ;;  %v743_v46 = vor.u32 %v950_v41, %v742_v40  ;;  %v734_v47 = vld [vmem:[#allocation5 + $0x68] sm:$0xf]  ;;  %v947_v48 = vld [vmem:[#allocation5 + $0x74] sm:$0xf0]  ;;  %v945_v49 = vld [vmem:[#allocation5 + $0x6c] sm:$0xf]  ;;  %v747_v50 = vor.u32 %v948_v42, %v744_v43 }
  0x20   :  { %325 = vmatpush.bf16.msra.mxu3 %v771_v33  ;;  %v736_v51 = vld [vmem:[#allocation5 + $0x78] sm:$0xf0]  ;;  %v726_v52 = vld [vmem:[#allocation5 + $0x60] sm:$0xf]  ;;  %v946_v53 = vld [vmem:[#allocation5 + $0x6c] sm:$0xf0]  ;;  %v735_v56 = vor.u32 %v947_v48, %v734_v47 }
  0x21   :  { %286 = vmatpush.bf16.msra.mxu0 %v759_v34  ;;  %299 = vmatpush.bf16.msra.mxu1 %v763_v38  ;;  %v944_v54 = vld [vmem:[#allocation5 + $0x64] sm:$0xf]  ;;  %v728_v55 = vld [vmem:[#allocation5 + $0x70] sm:$0xf0]  ;;  %v739_v57 = vor.u32 %v945_v49, %v736_v51  ;;  %v727_v58 = vor.u32 %v946_v53, %v726_v52  ;;  %v718_v59 = vld [vmem:[#allocation5 + $0x48] sm:$0xf] }
  0x22   :  { %v943_v60 = vld [vmem:[#allocation5 + $0x54] sm:$0xf0]  ;;  %v941_v61 = vld [vmem:[#allocation5 + $0x4c] sm:$0xf]  ;;  %v731_v62 = vor.u32 %v944_v54, %v728_v55  ;;  %v720_v63 = vld [vmem:[#allocation5 + $0x58] sm:$0xf0] }
  0x23   :  { %313 = vmatpush.bf16.msra.mxu2 %v751_v44  ;;  %v710_v0 = vld [vmem:[#allocation5 + $0x40] sm:$0xf]  ;;  %v942_v1 = vld [vmem:[#allocation5 + $0x4c] sm:$0xf0]  ;;  %v940_v2 = vld [vmem:[#allocation5 + $0x44] sm:$0xf]  ;;  %v719_v4 = vor.u32 %v943_v60, %v718_v59  ;;  %v723_v5 = vor.u32 %v941_v61, %v720_v63 }
  0x24   :  { %326 = vmatpush.bf16.msra.mxu3 %v755_v45  ;;  %v712_v3 = vld [vmem:[#allocation5 + $0x50] sm:$0xf0]  ;;  %v711_v6 = vor.u32 %v942_v1, %v710_v0  ;;  %v702_v7 = vld [vmem:[#allocation5 + $0x28] sm:$0xf]  ;;  %v939_v8 = vld [vmem:[#allocation5 + $0x34] sm:$0xf0] }
  0x25   :  { %287 = vmatpush.bf16.msra.mxu0 %v743_v46  ;;  %300 = vmatpush.bf16.msra.mxu1 %v747_v50  ;;  %v937_v9 = vld [vmem:[#allocation5 + $0x2c] sm:$0xf]  ;;  %v715_v10 = vor.u32 %v940_v2, %v712_v3  ;;  %v704_v11 = vld [vmem:[#allocation5 + $0x38] sm:$0xf0]  ;;  %v694_v12 = vld [vmem:[#allocation5 + $0x20] sm:$0xf]  ;;  %v703_v16 = vor.u32 %v939_v8, %v702_v7 }
  0x26   :  { %v938_v13 = vld [vmem:[#allocation5 + $0x2c] sm:$0xf0]  ;;  %v936_v14 = vld [vmem:[#allocation5 + $0x24] sm:$0xf]  ;;  %v696_v15 = vld [vmem:[#allocation5 + $0x30] sm:$0xf0]  ;;  %v707_v17 = vor.u32 %v937_v9, %v704_v11 }
  0x27   :  { %314 = vmatpush.bf16.msra.mxu2 %v735_v56  ;;  %v695_v18 = vor.u32 %v938_v13, %v694_v12  ;;  %v686_v19 = vld [vmem:[#allocation5 + $0x8] sm:$0xf]  ;;  %v935_v20 = vld [vmem:[#allocation5 + $0x14] sm:$0xf0]  ;;  %v933_v21 = vld [vmem:[#allocation5 + $0xc] sm:$0xf]  ;;  %v699_v22 = vor.u32 %v936_v14, %v696_v15 }
  0x28   :  { %327 = vmatpush.bf16.msra.mxu3 %v739_v57  ;;  %v688_v23 = vld [vmem:[#allocation5 + $0x18] sm:$0xf0]  ;;  %v678_v24 = vld [vmem:[#allocation5] sm:$0xf]  ;;  %v934_v25 = vld [vmem:[#allocation5 + $0xc] sm:$0xf0]  ;;  %v687_v28 = vor.u32 %v935_v20, %v686_v19 }
  0x29   :  { %288 = vmatpush.bf16.msra.mxu0 %v727_v58  ;;  %301 = vmatpush.bf16.msra.mxu1 %v731_v62  ;;  %v932_v26 = vld [vmem:[#allocation5 + $0x4] sm:$0xf]  ;;  %v680_v27 = vld [vmem:[#allocation5 + $0x10] sm:$0xf0]  ;;  %v80_v29 = vld [vmem:[#allocation2] sm:$0xff]  ;;  %v691_v30 = vor.u32 %v933_v21, %v688_v23  ;;  %v679_v31 = vor.u32 %v934_v25, %v678_v24  ;;  %s1142_s15 = smov [#allocation10]  }
  0x2a   :  { %v683_v32 = vor.u32 %v932_v26, %v680_v27  ;;  %v971_v33 = vld [vmem:[#allocation8 + $0x38] sm:$0xff]  ;;  %v81_v34 = vpack.c.bf16 %v80_v29, %v80_v29  ;;  %v970_v37 = vld [vmem:[#allocation8 + $0x30] sm:$0xff]  ;;  %v969_v41 = vld [vmem:[#allocation8 + $0x28] sm:$0xff]  ;;  %s662_s16 = sshll.u32 %s1142_s15, 4  ;;  %s664_s19 = sshll.u32 %s1196_s5, 4  ;;  %s663_s16 = int_to_ptr.vmem [resolvable:$true] %s662_s16  ;;  %s665_s19 = int_to_ptr.hbm [resolvable:$true] %s664_s19 }
  0x2b   :  { %315 = vmatpush.bf16.msra.mxu2 %v719_v4  ;;  %v979_v35 = vld [vmem:[#allocation8 + $0x78] sm:$0xff]  ;;  %v978_v39 = vld [vmem:[#allocation8 + $0x70] sm:$0xff]  ;;  %v977_v43 = vld [vmem:[#allocation8 + $0x68] sm:$0xff] }
  0x2c   :  { %328 = vmatpush.bf16.msra.mxu3 %v723_v5  ;;  %v987_v36 = vld [vmem:[#allocation8 + $0xb8] sm:$0xff]  ;;  %v986_v40 = vld [vmem:[#allocation8 + $0xb0] sm:$0xff]  ;;  %v985_v44 = vld [vmem:[#allocation8 + $0xa8] sm:$0xff] }
  0x2d   :  { %289 = vmatpush.bf16.msra.mxu0 %v711_v6  ;;  %302 = vmatpush.bf16.msra.mxu1 %v715_v10  ;;  %v995_v38 = vld [vmem:[#allocation8 + $0xf8] sm:$0xff]  ;;  %v994_v42 = vld [vmem:[#allocation8 + $0xf0] sm:$0xff]  ;;  %v968_v45 = vld [vmem:[#allocation8 + $0x20] sm:$0xff] }
  0x2e   :  { %v993_v46 = vld [vmem:[#allocation8 + $0xe8] sm:$0xff]  ;;  %v976_v47 = vld [vmem:[#allocation8 + $0x60] sm:$0xff]  ;;  %v967_v49 = vld [vmem:[#allocation8 + $0x18] sm:$0xff] }
  0x2f   :  { %316 = vmatpush.bf16.msra.mxu2 %v703_v16  ;;  %v984_v48 = vld [vmem:[#allocation8 + $0xa0] sm:$0xff]  ;;  %v975_v51 = vld [vmem:[#allocation8 + $0x58] sm:$0xff]  ;;  %v966_v53 = vld [vmem:[#allocation8 + $0x10] sm:$0xff] }
  0x30   :  { %329 = vmatpush.bf16.msra.mxu3 %v707_v17  ;;  %v992_v50 = vld [vmem:[#allocation8 + $0xe0] sm:$0xff]  ;;  %v983_v52 = vld [vmem:[#allocation8 + $0x98] sm:$0xff]  ;;  %v974_v55 = vld [vmem:[#allocation8 + $0x50] sm:$0xff] }
  0x31   :  { %290 = vmatpush.bf16.msra.mxu0 %v695_v18  ;;  %303 = vmatpush.bf16.msra.mxu1 %v699_v22  ;;  %v991_v54 = vld [vmem:[#allocation8 + $0xd8] sm:$0xff]  ;;  %v965_v56 = vld [vmem:[#allocation8 + $0x8] sm:$0xff]  ;;  %v982_v57 = vld [vmem:[#allocation8 + $0x90] sm:$0xff] }
  0x32   :  { %v990_v58 = vld [vmem:[#allocation8 + $0xd0] sm:$0xff]  ;;  %v973_v59 = vld [vmem:[#allocation8 + $0x48] sm:$0xff]  ;;  %v964_v60 = vld [vmem:[#allocation8] sm:$0xff] }
  0x33   :  { %317 = vmatpush.bf16.msra.mxu2 %v687_v28  ;;  %v981_v61 = vld [vmem:[#allocation8 + $0x88] sm:$0xff]  ;;  %v972_v63 = vld [vmem:[#allocation8 + $0x40] sm:$0xff]  ;;  %v114_v2 = vld [vmem:[#allocation7] sm:$0xf] }
  0x34   :  { %330 = vmatpush.bf16.msra.mxu3 %v691_v30  ;;  %v989_v62 = vld [vmem:[#allocation8 + $0xc8] sm:$0xff]  ;;  %v980_v0 = vld [vmem:[#allocation8 + $0x80] sm:$0xff]  ;;  %v116_v3 = vperm.slane %v114_v2, 0  ;;  %v117_v4 = vperm.slane %v114_v2, 1  ;;  %v118_v9 = vperm.slane %v114_v2, 2  ;;  %v119_v11 = vperm.slane %v114_v2, 3 }
  0x35   :  { %291 = vmatpush.bf16.msra.mxu0 %v679_v31  ;;  %304 = vmatpush.bf16.msra.mxu1 %v683_v32  ;;  %v988_v1 = vld [vmem:[#allocation8 + $0xc0] sm:$0xff]  ;;  %v1005_v27 = vld [vmem:[%s1195_s4] ss:$0 sm:$0xff] }
  0x36   :  { %318 = vmatmul.bf16.vlgmr.msra.gmra.mxu2 %v81_v34 }
  0x37   :  { %331 = vmatmul.bf16.vlgmr.msra.gmra.mxu3 %v81_v34  ;;  %630 = vmatpush.bf16.msrb.mxu2 %v987_v36 }
  0x38   :  { %292 = vmatmul.bf16.vlgmr.msra.gmra.mxu0 %v81_v34  ;;  %305 = vmatmul.bf16.vlgmr.msra.gmra.mxu1 %v81_v34 }
  0x39   :  { %604 = vmatpush.bf16.msrb.mxu0 %v971_v33  ;;  %617 = vmatpush.bf16.msrb.mxu1 %v979_v35 }
  0x3a   :  { %643 = vmatpush.bf16.msrb.mxu3 %v995_v38 }
  0x3b   :  { %631 = vmatpush.bf16.msrb.mxu2 %v986_v40 }
  0x3d   :  { %605 = vmatpush.bf16.msrb.mxu0 %v970_v37  ;;  %618 = vmatpush.bf16.msrb.mxu1 %v978_v39 }
  0x3e   :  { %644 = vmatpush.bf16.msrb.mxu3 %v994_v42 }
  0x3f   :  { %632 = vmatpush.bf16.msrb.mxu2 %v985_v44 }
  0x41   :  { %606 = vmatpush.bf16.msrb.mxu0 %v969_v41  ;;  %619 = vmatpush.bf16.msrb.mxu1 %v977_v43 }
  0x42   :  { %645 = vmatpush.bf16.msrb.mxu3 %v993_v46 }
  0x43   :  { %633 = vmatpush.bf16.msrb.mxu2 %v984_v48 }
  0x45   :  { %607 = vmatpush.bf16.msrb.mxu0 %v968_v45  ;;  %620 = vmatpush.bf16.msrb.mxu1 %v976_v47 }
  0x46   :  { %646 = vmatpush.bf16.msrb.mxu3 %v992_v50 }
  0x47   :  { %634 = vmatpush.bf16.msrb.mxu2 %v983_v52 }
  0x49   :  { %608 = vmatpush.bf16.msrb.mxu0 %v967_v49  ;;  %621 = vmatpush.bf16.msrb.mxu1 %v975_v51 }
  0x4a   :  { %647 = vmatpush.bf16.msrb.mxu3 %v991_v54 }
  0x4b   :  { %635 = vmatpush.bf16.msrb.mxu2 %v982_v57 }
  0x4d   :  { %609 = vmatpush.bf16.msrb.mxu0 %v966_v53  ;;  %622 = vmatpush.bf16.msrb.mxu1 %v974_v55 }
  0x4e   :  { %648 = vmatpush.bf16.msrb.mxu3 %v990_v58 }
  0x4f   :  { %636 = vmatpush.bf16.msrb.mxu2 %v981_v61 }
  0x51   :  { %610 = vmatpush.bf16.msrb.mxu0 %v965_v56  ;;  %623 = vmatpush.bf16.msrb.mxu1 %v973_v59 }
  0x52   :  { %649 = vmatpush.bf16.msrb.mxu3 %v989_v62 }
  0x53   :  { %637 = vmatpush.bf16.msrb.mxu2 %v980_v0 }
  0x55   :  { %611 = vmatpush.bf16.msrb.mxu0 %v964_v60  ;;  %624 = vmatpush.bf16.msrb.mxu1 %v972_v63 }
  0x56   :  { %650 = vmatpush.bf16.msrb.mxu3 %v988_v1 }
  0xb5   :  { %v293_v5 = vpop.f32.mrf.mxu0  ;;  %v306_v7 = vpop.f32.mrf.mxu1 }
  0xb6   :  { %v294_v6 = vadd.f32 %v293_v5, %v116_v3  ;;  %v307_v8 = vadd.f32 %v306_v7, %v117_v4 }
  0xb8   :  { %v336_v10 = vmax.f32 %v294_v6, 0.0  ;;  %v337_v12 = vmax.f32 %v307_v8, 0.0 }
  0xb9   :  { %v319_v14 = vpop.f32.mrf.mxu2 }
  0xba   :  { %v340_v13 = vpack.c.bf16 %v336_v10, %v336_v10  ;;  %v341_v15 = vpack.c.bf16 %v337_v12, %v337_v12  ;;  %v320_v16 = vadd.f32 %v319_v14, %v118_v9  ;;  %v332_v17 = vpop.f32.mrf.mxu3 }
  0xbb   :  { %v333_v18 = vadd.f32 %v332_v17, %v119_v11 }
  0xbc   :  { %612 = vmatmul.bf16.vlgmr.msrb.gmra.mxu0 %v340_v13  ;;  %v338_v19 = vmax.f32 %v320_v16, 0.0  ;;  %625 = vmatmul.bf16.vlgmr.msrb.gmra.mxu1 %v341_v15 }
  0xbd   :  { %v295_v20 = vpop.f32.mrf.mxu0  ;;  %v339_v21 = vmax.f32 %v333_v18, 0.0  ;;  %v308_v22 = vpop.f32.mrf.mxu1 }
  0xbe   :  { %v342_v23 = vpack.c.bf16 %v338_v19, %v338_v19 }
  0xbf   :  { %v343_v24 = vpack.c.bf16 %v339_v21, %v339_v21 }
  0xc0   :  { %638 = vmatmul.bf16.vlgmr.msrb.gmra.mxu2 %v342_v23 }
  0xc1   :  { %651 = vmatmul.bf16.vlgmr.msrb.gmra.mxu3 %v343_v24  ;;  %v321_v25 = vpop.f32.mrf.mxu2 }
  0xc2   :  { %v334_v26 = vpop.f32.mrf.mxu3 }
 0x139   :  { %v613_v28 = vpop.f32.mrf.mxu0  ;;  %v626_v29 = vpop.f32.mrf.mxu1 }
 0x13a   :  { %v614_v30 = vadd.f32 %v1005_v27, %v613_v28 }
 0x13c   :  { %v627_v31 = vadd.f32 %v626_v29, %v614_v30 }
 0x141   :  { %v615_v32 = vpop.f32.mrf.mxu0  ;;  %v628_v33 = vpop.f32.mrf.mxu1 }
 0x143   :  { %v639_v34 = vpop.f32.mrf.mxu2 }
 0x144   :  { %v640_v35 = vadd.f32 %v639_v34, %v627_v31  ;;  %v652_v36 = vpop.f32.mrf.mxu3 }
 0x146   :  { %v653_v37 = vadd.f32 %v652_v36, %v640_v35 }
 0x148   :  { %656 = vst [vmem:[#allocation10] sm:$0xff] %v653_v37 }
 0x149   :  { %667 = dma.vmem_to_hbm [thread:$0]  %s663_s16, 128, %s665_s19, [#allocation4]  }
 0x14b   :  { %v641_v38 = vpop.f32.mrf.mxu2 }
 0x14c   :  { %v654_v39 = vpop.f32.mrf.mxu3 }
 0x14d   :  { %1132 = dma.done.wait [#allocation4], 128  }
 0x14e   :  { %1133 = vsyncadd [#allocation4], 4294967168 }
 0x14f   :  { %672 = vsyncpa [#allocation3], 1 }
 0x150   :  { %673 = vsyncpa [#allocation6], 1 }
 0x151   :  { %674 = vsyncpa [#allocation9], 1 }
 0x152   :  { %675 = vsyncpa [#allocation4], 1 }

</bundles_post_ra>
